<compile_context>
chip_gen: v7x
topology: tpu7x:2x2x1
jax: 0.10.0
libtpu: 0.0.40
codegen_flags: <defaults>
</compile_context>

<pallas_src>
import jax
import jax.numpy as jnp
from jax import lax
from jax.experimental import pallas as pl
from jax.experimental.pallas import tpu as pltpu

_LANE = 128


def _rnn_kernel(text_ref, emb_ref, wih_ref, b_ref, whh_ref, wfc_ref, bfc_ref,
                out_ref, proj_ref):
    """text_ref: (T, B) int32 token ids, SMEM resident.
       emb_ref:  (V, E)   embedding table.
       wih_ref:  (E, Hp)  W_ih^T, zero-padded to Hp lanes.
       b_ref:    (1, Hp)  b_ih + b_hh, zero-padded.
       whh_ref:  (Hp, Hp) W_hh^T, zero-padded (rows and cols).
       wfc_ref:  (Hp, Op) W_fc^T, zero-padded.
       bfc_ref:  (1, Op)  b_fc, zero-padded.
       out_ref:  (B, Op)  final logits (padded lanes are 0).
       proj_ref: (V, Hp)  VMEM scratch: per-token pre-projected inputs.
    """
    T, B = text_ref.shape

    # One-time, off the serial chain: proj[v] = emb[v] @ W_ih^T + (b_ih+b_hh).
    proj_ref[...] = (
        jnp.dot(emb_ref[...], wih_ref[...], preferred_element_type=jnp.float32)
        + b_ref[...])

    def step(t, h):
        # In-kernel embedding/projection gather: B dynamic row picks from the
        # VMEM-resident table using SMEM token ids.  These loads do not depend
        # on h, so they sit off the recurrence critical path.
        rows = [proj_ref[pl.ds(text_ref[t, b], 1), :] for b in range(B)]
        xp = jnp.concatenate(rows, axis=0)                       # (B, Hp)
        # h_t = tanh(x_proj_t + h_{t-1} @ W_hh^T): one dependent MXU push +
        # one EUP tanh per step on the serial chain.
        return jnp.tanh(
            xp + jnp.dot(h, whh_ref[...], preferred_element_type=jnp.float32))

    h0 = jnp.zeros((B, whh_ref.shape[0]), jnp.float32)
    # T is tiny here; full unroll gives the LLO scheduler the whole chain.
    # For long sequences switch to a bounded unroll (e.g. unroll=8).
    h_final = lax.fori_loop(0, T, step, h0, unroll=True)

    # Fused fc(hidden.squeeze(0)): (B, Hp) @ (Hp, Op) + (1, Op), lane-dense.
    out_ref[...] = (
        jnp.dot(h_final, wfc_ref[...], preferred_element_type=jnp.float32)
        + bfc_ref[...]).astype(out_ref.dtype)


def _zero_pad(x, target, axis):
    pad = target - x.shape[axis]
    if pad <= 0:
        return x
    widths = [(0, 0)] * x.ndim
    widths[axis] = (0, pad)
    return jnp.pad(x, widths)


@jax.jit
def rnn_forward(text, params):
    """text: (T, B) int32.  Returns (B, output_dim) float32 logits."""
    emb_table = params["embedding"]        # (V, E)
    w_ih = params["w_ih"]                  # (H, E)  (PyTorch layout)
    w_hh = params["w_hh"]                  # (H, H)
    b_ih = params["b_ih"]                  # (H,)
    b_hh = params["b_hh"]                  # (H,)
    w_fc = params["w_fc"]                  # (O, H)
    b_fc = params["b_fc"]                  # (O,)

    T, B = text.shape
    V, E = emb_table.shape
    H = w_hh.shape[0]
    O = w_fc.shape[0]

    # Zero-pad hidden / output lane dims up to full 128-lane vreg width.
    # Padding is exactly neutral: padded x_proj lanes are 0, tanh(0) = 0, and
    # padded weight rows/cols are 0, so the real lanes are bit-identical.
    Hp = pl.cdiv(H, _LANE) * _LANE
    Op = pl.cdiv(O, _LANE) * _LANE

    wih_t = _zero_pad(jnp.transpose(w_ih), Hp, axis=1)                 # (E, Hp)
    whh_t = _zero_pad(_zero_pad(jnp.transpose(w_hh), Hp, 0), Hp, 1)    # (Hp, Hp)
    wfc_t = _zero_pad(_zero_pad(jnp.transpose(w_fc), Hp, 0), Op, 1)    # (Hp, Op)
    b_pad = _zero_pad((b_ih + b_hh).reshape(1, H), Hp, axis=1)         # (1, Hp)
    bfc_pad = _zero_pad(b_fc.reshape(1, O), Op, axis=1)                # (1, Op)

    vmem = lambda: pl.BlockSpec(memory_space=pltpu.MemorySpace.VMEM)
    smem = lambda: pl.BlockSpec(memory_space=pltpu.MemorySpace.SMEM)

    out_padded = pl.pallas_call(
        _rnn_kernel,
        out_shape=jax.ShapeDtypeStruct((B, Op), jnp.float32),
        in_specs=[smem(),                  # text -> SMEM (token ids)
                  vmem(), vmem(), vmem(),  # emb, W_ih^T, bias
                  vmem(), vmem(), vmem()], # W_hh^T, W_fc^T, b_fc
        out_specs=vmem(),
        scratch_shapes=[pltpu.VMEM((V, Hp), jnp.float32)],
        # Total VMEM footprint < 0.3 MiB; default scoped limits are plenty on
        # v5e/v6e/v7x, so no vmem_limit_bytes request.
    )(text, emb_table, wih_t, b_pad, whh_t, wfc_t, bfc_pad)

    return out_padded[:, :O]


def init_params(key, input_dim, embedding_dim, hidden_dim, output_dim):
    ks = jax.random.split(key, 7)
    s_rnn = 1.0 / jnp.sqrt(hidden_dim)
    return {
        "embedding": jax.random.normal(ks[0], (input_dim, embedding_dim),
                                       jnp.float32),
        "w_ih": jax.random.uniform(ks[1], (hidden_dim, embedding_dim),
                                   jnp.float32, -s_rnn, s_rnn),
        "w_hh": jax.random.uniform(ks[2], (hidden_dim, hidden_dim),
                                   jnp.float32, -s_rnn, s_rnn),
        "b_ih": jax.random.uniform(ks[3], (hidden_dim,), jnp.float32,
                                   -s_rnn, s_rnn),
        "b_hh": jax.random.uniform(ks[4], (hidden_dim,), jnp.float32,
                                   -s_rnn, s_rnn),
        "w_fc": jax.random.uniform(ks[5], (output_dim, hidden_dim),
                                   jnp.float32, -s_rnn, s_rnn),
        "b_fc": jax.random.uniform(ks[6], (output_dim,), jnp.float32,
                                   -s_rnn, s_rnn),
    }


def _reference_forward(text, params):
    """Pure-JAX reference matching the PyTorch semantics."""
    emb = params["embedding"][text]                    # (T, B, E)

    def step(h, x_t):
        h_new = jnp.tanh(x_t @ params["w_ih"].T + params["b_ih"]
                         + h @ params["w_hh"].T + params["b_hh"])
        return h_new, None

    B = text.shape[1]
    h0 = jnp.zeros((B, params["w_hh"].shape[0]), jnp.float32)
    h_final, _ = jax.lax.scan(step, h0, emb)
    return h_final @ params["w_fc"].T + params["b_fc"]


if __name__ == "__main__":
    INPUT_DIM = 50      # vocab size
    EMBEDDING_DIM = 32
    HIDDEN_DIM = 32
    OUTPUT_DIM = 4
    SEQ_LEN = 8
    BATCH = 2

    key = jax.random.PRNGKey(0)
    pkey, tkey = jax.random.split(key)
    params = init_params(pkey, INPUT_DIM, EMBEDDING_DIM, HIDDEN_DIM, OUTPUT_DIM)

    text = jax.random.randint(tkey, (SEQ_LEN, BATCH), 0, INPUT_DIM,
                              dtype=jnp.int32)

    out = jax.block_until_ready(rnn_forward(text, params))
    ref = jax.block_until_ready(_reference_forward(text, params))

    assert out.shape == (BATCH, OUTPUT_DIM)
    assert jnp.allclose(out, ref, atol=1e-5, rtol=1e-5), "mismatch vs reference"

    print("KERNEL_OK")
</pallas_src>

<mosaic_0001>
module attributes {stable_mosaic.version = 11 : i64} {
  func.func @_rnn_kernel(%arg0: memref<8x2xi32, #tpu.memory_space<smem>>, %arg1: memref<50x32xf32, #tpu.memory_space<vmem>>, %arg2: memref<32x128xf32, #tpu.memory_space<vmem>>, %arg3: memref<1x128xf32, #tpu.memory_space<vmem>>, %arg4: memref<128x128xf32, #tpu.memory_space<vmem>>, %arg5: memref<128x128xf32, #tpu.memory_space<vmem>>, %arg6: memref<1x128xf32, #tpu.memory_space<vmem>>, %arg7: memref<2x128xf32, #tpu.memory_space<vmem>>, %arg8: memref<50x128xf32, #tpu.memory_space<vmem>>) attributes {dimension_semantics = [], scalar_prefetch = 0 : i64, scratch_operands = 1 : i64, tpu.core_type = #tpu.core_type<tc>} {
    %c0 = arith.constant 0 : index
    %c0_0 = arith.constant 0 : index
    %0 = vector.load %arg1[%c0, %c0_0] : memref<50x32xf32, #tpu.memory_space<vmem>>, vector<50x32xf32>
    %c0_1 = arith.constant 0 : index
    %c0_2 = arith.constant 0 : index
    %1 = vector.load %arg2[%c0_1, %c0_2] : memref<32x128xf32, #tpu.memory_space<vmem>>, vector<32x128xf32>
    %cst = arith.constant dense<0.000000e+00> : vector<50x128xf32>
    %2 = tpu.matmul %0, %1, %cst {dimension_numbers = #tpu.dot_dimension_numbers<[1], [0], [0], [1], [0, 0, 1, 1], [], []>} : vector<50x32xf32>, vector<32x128xf32>, vector<50x128xf32> -> vector<50x128xf32>
    %c0_3 = arith.constant 0 : index
    %c0_4 = arith.constant 0 : index
    %3 = vector.load %arg3[%c0_3, %c0_4] : memref<1x128xf32, #tpu.memory_space<vmem>>, vector<1x128xf32>
    %4 = vector.broadcast %3 : vector<1x128xf32> to vector<50x128xf32>
    %5 = arith.addf %2, %4 : vector<50x128xf32>
    %c0_5 = arith.constant 0 : index
    %c0_6 = arith.constant 0 : index
    %6 = vector.load %arg8[%c0_5, %c0_6] : memref<50x128xf32, #tpu.memory_space<vmem>>, vector<50x128xf32>
    tpu.vector_store %arg8[%c0_5, %c0_6], %5 {strides = array<i32>} : memref<50x128xf32, #tpu.memory_space<vmem>>, vector<50x128xf32>,
    %cst_7 = arith.constant 0.000000e+00 : f32
    %7 = vector.broadcast %cst_7 : f32 to vector<2x128xf32>
    %c0_i32 = arith.constant 0 : i32
    %8 = arith.index_cast %c0_i32 : i32 to index
    %c0_8 = arith.constant 0 : index
    %9 = memref.load %arg0[%8, %c0_8] : memref<8x2xi32, #tpu.memory_space<smem>>
    %10 = arith.index_cast %9 : i32 to index
    %c0_9 = arith.constant 0 : index
    %11 = vector.load %arg8[%10, %c0_9] : memref<50x128xf32, #tpu.memory_space<vmem>>, vector<1x128xf32>
    %12 = arith.index_cast %c0_i32 : i32 to index
    %c1 = arith.constant 1 : index
    %13 = memref.load %arg0[%12, %c1] : memref<8x2xi32, #tpu.memory_space<smem>>
    %14 = arith.index_cast %13 : i32 to index
    %c0_10 = arith.constant 0 : index
    %15 = vector.load %arg8[%14, %c0_10] : memref<50x128xf32, #tpu.memory_space<vmem>>, vector<1x128xf32>
    %16 = tpu.concatenate %11, %15 in 0 : vector<1x128xf32>, vector<1x128xf32> -> vector<2x128xf32>
    %c0_11 = arith.constant 0 : index
    %c0_12 = arith.constant 0 : index
    %17 = vector.load %arg4[%c0_11, %c0_12] : memref<128x128xf32, #tpu.memory_space<vmem>>, vector<128x128xf32>
    %cst_13 = arith.constant dense<0.000000e+00> : vector<2x128xf32>
    %18 = tpu.matmul %7, %17, %cst_13 {dimension_numbers = #tpu.dot_dimension_numbers<[1], [0], [0], [1], [0, 0, 1, 1], [], []>} : vector<2x128xf32>, vector<128x128xf32>, vector<2x128xf32> -> vector<2x128xf32>
    %19 = arith.addf %16, %18 : vector<2x128xf32>
    %20 = math.tanh %19 : vector<2x128xf32>
    %c1_i32 = arith.constant 1 : i32
    %21 = arith.index_cast %c1_i32 : i32 to index
    %c0_14 = arith.constant 0 : index
    %22 = memref.load %arg0[%21, %c0_14] : memref<8x2xi32, #tpu.memory_space<smem>>
    %23 = arith.index_cast %22 : i32 to index
    %c0_15 = arith.constant 0 : index
    %24 = vector.load %arg8[%23, %c0_15] : memref<50x128xf32, #tpu.memory_space<vmem>>, vector<1x128xf32>
    %25 = arith.index_cast %c1_i32 : i32 to index
    %c1_16 = arith.constant 1 : index
    %26 = memref.load %arg0[%25, %c1_16] : memref<8x2xi32, #tpu.memory_space<smem>>
    %27 = arith.index_cast %26 : i32 to index
    %c0_17 = arith.constant 0 : index
    %28 = vector.load %arg8[%27, %c0_17] : memref<50x128xf32, #tpu.memory_space<vmem>>, vector<1x128xf32>
    %29 = tpu.concatenate %24, %28 in 0 : vector<1x128xf32>, vector<1x128xf32> -> vector<2x128xf32>
    %c0_18 = arith.constant 0 : index
    %c0_19 = arith.constant 0 : index
    %30 = vector.load %arg4[%c0_18, %c0_19] : memref<128x128xf32, #tpu.memory_space<vmem>>, vector<128x128xf32>
    %cst_20 = arith.constant dense<0.000000e+00> : vector<2x128xf32>
    %31 = tpu.matmul %20, %30, %cst_20 {dimension_numbers = #tpu.dot_dimension_numbers<[1], [0], [0], [1], [0, 0, 1, 1], [], []>} : vector<2x128xf32>, vector<128x128xf32>, vector<2x128xf32> -> vector<2x128xf32>
    %32 = arith.addf %29, %31 : vector<2x128xf32>
    %33 = math.tanh %32 : vector<2x128xf32>
    %c2_i32 = arith.constant 2 : i32
    %34 = arith.index_cast %c2_i32 : i32 to index
    %c0_21 = arith.constant 0 : index
    %35 = memref.load %arg0[%34, %c0_21] : memref<8x2xi32, #tpu.memory_space<smem>>
    %36 = arith.index_cast %35 : i32 to index
    %c0_22 = arith.constant 0 : index
    %37 = vector.load %arg8[%36, %c0_22] : memref<50x128xf32, #tpu.memory_space<vmem>>, vector<1x128xf32>
    %38 = arith.index_cast %c2_i32 : i32 to index
    %c1_23 = arith.constant 1 : index
    %39 = memref.load %arg0[%38, %c1_23] : memref<8x2xi32, #tpu.memory_space<smem>>
    %40 = arith.index_cast %39 : i32 to index
    %c0_24 = arith.constant 0 : index
    %41 = vector.load %arg8[%40, %c0_24] : memref<50x128xf32, #tpu.memory_space<vmem>>, vector<1x128xf32>
    %42 = tpu.concatenate %37, %41 in 0 : vector<1x128xf32>, vector<1x128xf32> -> vector<2x128xf32>
    %c0_25 = arith.constant 0 : index
    %c0_26 = arith.constant 0 : index
    %43 = vector.load %arg4[%c0_25, %c0_26] : memref<128x128xf32, #tpu.memory_space<vmem>>, vector<128x128xf32>
    %cst_27 = arith.constant dense<0.000000e+00> : vector<2x128xf32>
    %44 = tpu.matmul %33, %43, %cst_27 {dimension_numbers = #tpu.dot_dimension_numbers<[1], [0], [0], [1], [0, 0, 1, 1], [], []>} : vector<2x128xf32>, vector<128x128xf32>, vector<2x128xf32> -> vector<2x128xf32>
    %45 = arith.addf %42, %44 : vector<2x128xf32>
    %46 = math.tanh %45 : vector<2x128xf32>
    %c3_i32 = arith.constant 3 : i32
    %47 = arith.index_cast %c3_i32 : i32 to index
    %c0_28 = arith.constant 0 : index
    %48 = memref.load %arg0[%47, %c0_28] : memref<8x2xi32, #tpu.memory_space<smem>>
    %49 = arith.index_cast %48 : i32 to index
    %c0_29 = arith.constant 0 : index
    %50 = vector.load %arg8[%49, %c0_29] : memref<50x128xf32, #tpu.memory_space<vmem>>, vector<1x128xf32>
    %51 = arith.index_cast %c3_i32 : i32 to index
    %c1_30 = arith.constant 1 : index
    %52 = memref.load %arg0[%51, %c1_30] : memref<8x2xi32, #tpu.memory_space<smem>>
    %53 = arith.index_cast %52 : i32 to index
    %c0_31 = arith.constant 0 : index
    %54 = vector.load %arg8[%53, %c0_31] : memref<50x128xf32, #tpu.memory_space<vmem>>, vector<1x128xf32>
    %55 = tpu.concatenate %50, %54 in 0 : vector<1x128xf32>, vector<1x128xf32> -> vector<2x128xf32>
    %c0_32 = arith.constant 0 : index
    %c0_33 = arith.constant 0 : index
    %56 = vector.load %arg4[%c0_32, %c0_33] : memref<128x128xf32, #tpu.memory_space<vmem>>, vector<128x128xf32>
    %cst_34 = arith.constant dense<0.000000e+00> : vector<2x128xf32>
    %57 = tpu.matmul %46, %56, %cst_34 {dimension_numbers = #tpu.dot_dimension_numbers<[1], [0], [0], [1], [0, 0, 1, 1], [], []>} : vector<2x128xf32>, vector<128x128xf32>, vector<2x128xf32> -> vector<2x128xf32>
    %58 = arith.addf %55, %57 : vector<2x128xf32>
    %59 = math.tanh %58 : vector<2x128xf32>
    %c4_i32 = arith.constant 4 : i32
    %60 = arith.index_cast %c4_i32 : i32 to index
    %c0_35 = arith.constant 0 : index
    %61 = memref.load %arg0[%60, %c0_35] : memref<8x2xi32, #tpu.memory_space<smem>>
    %62 = arith.index_cast %61 : i32 to index
    %c0_36 = arith.constant 0 : index
    %63 = vector.load %arg8[%62, %c0_36] : memref<50x128xf32, #tpu.memory_space<vmem>>, vector<1x128xf32>
    %64 = arith.index_cast %c4_i32 : i32 to index
    %c1_37 = arith.constant 1 : index
    %65 = memref.load %arg0[%64, %c1_37] : memref<8x2xi32, #tpu.memory_space<smem>>
    %66 = arith.index_cast %65 : i32 to index
    %c0_38 = arith.constant 0 : index
    %67 = vector.load %arg8[%66, %c0_38] : memref<50x128xf32, #tpu.memory_space<vmem>>, vector<1x128xf32>
    %68 = tpu.concatenate %63, %67 in 0 : vector<1x128xf32>, vector<1x128xf32> -> vector<2x128xf32>
    %c0_39 = arith.constant 0 : index
    %c0_40 = arith.constant 0 : index
    %69 = vector.load %arg4[%c0_39, %c0_40] : memref<128x128xf32, #tpu.memory_space<vmem>>, vector<128x128xf32>
    %cst_41 = arith.constant dense<0.000000e+00> : vector<2x128xf32>
    %70 = tpu.matmul %59, %69, %cst_41 {dimension_numbers = #tpu.dot_dimension_numbers<[1], [0], [0], [1], [0, 0, 1, 1], [], []>} : vector<2x128xf32>, vector<128x128xf32>, vector<2x128xf32> -> vector<2x128xf32>
    %71 = arith.addf %68, %70 : vector<2x128xf32>
    %72 = math.tanh %71 : vector<2x128xf32>
    %c5_i32 = arith.constant 5 : i32
    %73 = arith.index_cast %c5_i32 : i32 to index
    %c0_42 = arith.constant 0 : index
    %74 = memref.load %arg0[%73, %c0_42] : memref<8x2xi32, #tpu.memory_space<smem>>
    %75 = arith.index_cast %74 : i32 to index
    %c0_43 = arith.constant 0 : index
    %76 = vector.load %arg8[%75, %c0_43] : memref<50x128xf32, #tpu.memory_space<vmem>>, vector<1x128xf32>
    %77 = arith.index_cast %c5_i32 : i32 to index
    %c1_44 = arith.constant 1 : index
    %78 = memref.load %arg0[%77, %c1_44] : memref<8x2xi32, #tpu.memory_space<smem>>
    %79 = arith.index_cast %78 : i32 to index
    %c0_45 = arith.constant 0 : index
    %80 = vector.load %arg8[%79, %c0_45] : memref<50x128xf32, #tpu.memory_space<vmem>>, vector<1x128xf32>
    %81 = tpu.concatenate %76, %80 in 0 : vector<1x128xf32>, vector<1x128xf32> -> vector<2x128xf32>
    %c0_46 = arith.constant 0 : index
    %c0_47 = arith.constant 0 : index
    %82 = vector.load %arg4[%c0_46, %c0_47] : memref<128x128xf32, #tpu.memory_space<vmem>>, vector<128x128xf32>
    %cst_48 = arith.constant dense<0.000000e+00> : vector<2x128xf32>
    %83 = tpu.matmul %72, %82, %cst_48 {dimension_numbers = #tpu.dot_dimension_numbers<[1], [0], [0], [1], [0, 0, 1, 1], [], []>} : vector<2x128xf32>, vector<128x128xf32>, vector<2x128xf32> -> vector<2x128xf32>
    %84 = arith.addf %81, %83 : vector<2x128xf32>
    %85 = math.tanh %84 : vector<2x128xf32>
    %c6_i32 = arith.constant 6 : i32
    %86 = arith.index_cast %c6_i32 : i32 to index
    %c0_49 = arith.constant 0 : index
    %87 = memref.load %arg0[%86, %c0_49] : memref<8x2xi32, #tpu.memory_space<smem>>
    %88 = arith.index_cast %87 : i32 to index
    %c0_50 = arith.constant 0 : index
    %89 = vector.load %arg8[%88, %c0_50] : memref<50x128xf32, #tpu.memory_space<vmem>>, vector<1x128xf32>
    %90 = arith.index_cast %c6_i32 : i32 to index
    %c1_51 = arith.constant 1 : index
    %91 = memref.load %arg0[%90, %c1_51] : memref<8x2xi32, #tpu.memory_space<smem>>
    %92 = arith.index_cast %91 : i32 to index
    %c0_52 = arith.constant 0 : index
    %93 = vector.load %arg8[%92, %c0_52] : memref<50x128xf32, #tpu.memory_space<vmem>>, vector<1x128xf32>
    %94 = tpu.concatenate %89, %93 in 0 : vector<1x128xf32>, vector<1x128xf32> -> vector<2x128xf32>
    %c0_53 = arith.constant 0 : index
    %c0_54 = arith.constant 0 : index
    %95 = vector.load %arg4[%c0_53, %c0_54] : memref<128x128xf32, #tpu.memory_space<vmem>>, vector<128x128xf32>
    %cst_55 = arith.constant dense<0.000000e+00> : vector<2x128xf32>
    %96 = tpu.matmul %85, %95, %cst_55 {dimension_numbers = #tpu.dot_dimension_numbers<[1], [0], [0], [1], [0, 0, 1, 1], [], []>} : vector<2x128xf32>, vector<128x128xf32>, vector<2x128xf32> -> vector<2x128xf32>
    %97 = arith.addf %94, %96 : vector<2x128xf32>
    %98 = math.tanh %97 : vector<2x128xf32>
    %c7_i32 = arith.constant 7 : i32
    %99 = arith.index_cast %c7_i32 : i32 to index
    %c0_56 = arith.constant 0 : index
    %100 = memref.load %arg0[%99, %c0_56] : memref<8x2xi32, #tpu.memory_space<smem>>
    %101 = arith.index_cast %100 : i32 to index
    %c0_57 = arith.constant 0 : index
    %102 = vector.load %arg8[%101, %c0_57] : memref<50x128xf32, #tpu.memory_space<vmem>>, vector<1x128xf32>
    %103 = arith.index_cast %c7_i32 : i32 to index
    %c1_58 = arith.constant 1 : index
    %104 = memref.load %arg0[%103, %c1_58] : memref<8x2xi32, #tpu.memory_space<smem>>
    %105 = arith.index_cast %104 : i32 to index
    %c0_59 = arith.constant 0 : index
    %106 = vector.load %arg8[%105, %c0_59] : memref<50x128xf32, #tpu.memory_space<vmem>>, vector<1x128xf32>
    %107 = tpu.concatenate %102, %106 in 0 : vector<1x128xf32>, vector<1x128xf32> -> vector<2x128xf32>
    %c0_60 = arith.constant 0 : index
    %c0_61 = arith.constant 0 : index
    %108 = vector.load %arg4[%c0_60, %c0_61] : memref<128x128xf32, #tpu.memory_space<vmem>>, vector<128x128xf32>
    %cst_62 = arith.constant dense<0.000000e+00> : vector<2x128xf32>
    %109 = tpu.matmul %98, %108, %cst_62 {dimension_numbers = #tpu.dot_dimension_numbers<[1], [0], [0], [1], [0, 0, 1, 1], [], []>} : vector<2x128xf32>, vector<128x128xf32>, vector<2x128xf32> -> vector<2x128xf32>
    %110 = arith.addf %107, %109 : vector<2x128xf32>
    %111 = math.tanh %110 : vector<2x128xf32>
    %c8_i32 = arith.constant 8 : i32
    %c0_63 = arith.constant 0 : index
    %c0_64 = arith.constant 0 : index
    %112 = vector.load %arg5[%c0_63, %c0_64] : memref<128x128xf32, #tpu.memory_space<vmem>>, vector<128x128xf32>
    %cst_65 = arith.constant dense<0.000000e+00> : vector<2x128xf32>
    %113 = tpu.matmul %111, %112, %cst_65 {dimension_numbers = #tpu.dot_dimension_numbers<[1], [0], [0], [1], [0, 0, 1, 1], [], []>} : vector<2x128xf32>, vector<128x128xf32>, vector<2x128xf32> -> vector<2x128xf32>
    %c0_66 = arith.constant 0 : index
    %c0_67 = arith.constant 0 : index
    %114 = vector.load %arg6[%c0_66, %c0_67] : memref<1x128xf32, #tpu.memory_space<vmem>>, vector<1x128xf32>
    %115 = vector.broadcast %114 : vector<1x128xf32> to vector<2x128xf32>
    %116 = arith.addf %113, %115 : vector<2x128xf32>
    %c0_68 = arith.constant 0 : index
    %c0_69 = arith.constant 0 : index
    %117 = vector.load %arg7[%c0_68, %c0_69] : memref<2x128xf32, #tpu.memory_space<vmem>>, vector<2x128xf32>
    tpu.vector_store %arg7[%c0_68, %c0_69], %116 {strides = array<i32>} : memref<2x128xf32, #tpu.memory_space<vmem>>, vector<2x128xf32>,
    return
  }
}

</mosaic_0001>

<bundles_post_ra>
// kernel: rnn_forward.1
= control target key start
LH: loop header
LB: loop body
LE: loop exit
PB: predicated region body
PF: predicated region fallthrough
CT: control target
= control target key end

     0   :  { %12 = vsyncpa [#allocation5], 0  ;;  %s2195_s0 = inlined_call_operand.vmem [shape: s32[8,2], index: 0, kind: input, shape index: {}]   ;;  %s2196_s1 = inlined_call_operand.vmem [shape: f32[50,32], index: 1, kind: input, shape index: {}]   ;;  %s2197_s2 = inlined_call_operand.vmem [shape: f32[32,128], index: 2, kind: input, shape index: {}]   ;;  %s2198_s3 = inlined_call_operand.vmem [shape: f32[1,128], index: 3, kind: input, shape index: {}]   ;;  %s2199_s4 = inlined_call_operand.vmem [shape: f32[128,128], index: 4, kind: input, shape index: {}]   ;;  %s2200_s5 = inlined_call_operand.vmem [shape: f32[128,128], index: 5, kind: input, shape index: {}]   ;;  %s2201_s6 = inlined_call_operand.vmem [shape: f32[1,128], index: 6, kind: input, shape index: {}]   ;;  %s2202_s7 = inlined_call_operand.hbm [shape: f32[2,128], index: 7, kind: output, shape index: {}]  }
   0x1   :  { %13 = vsyncpa [#allocation4], 0  ;;  %s20_s26 = sshll.u32 %s2195_s0, 4  ;;  %s21_s26 = int_to_ptr.vmem [resolvable:$true] %s20_s26 }
   0x2   :  { %s1760_s27 = scalar_lea.vmem %s21_s26, 128  ;;  %p1765_p1 = scmp.lt.s32.totalorder %s21_s26, %s21_s26 }
   0x3   :  { %p1761_p0 = scmp.ne.s32.totalorder %s21_s26, %s1760_s27  ;;  %p1766_p2 = scmp.lt.s32.totalorder %s1760_s27, %s1760_s27 }
   0x5   :  { %p1767_p3 = por %p1766_p2, %p1765_p1 }
   0x7   :  { %p1768_p4 = pnand %p1767_p3, %p1761_p0 }
   0x9   :  { %1771 = shalt.err (!%p1768_p4)
}
   0xa   :  { %s1798_s28 = smov [#allocation3]  }
   0xb   :  { %23 = dma.vmem_to_smem %s21_s26, 128, %s1798_s28, [#allocation5]  }
   0xc   :  { %1794 = dma.done.wait [#allocation5], 128  }
   0xd   :  { %1795 = vsyncadd [#allocation5], 4294967168 }
   0xe   :  { %39 = sfence }
   0xf   :  { %v47_v0 = vld [vmem:[%s2197_s2] sm:$0xff]  ;;  %v48_v1 = vld [vmem:[%s2197_s2 + $0x8] sm:$0xff]  ;;  %v49_v2 = vld [vmem:[%s2197_s2 + $0x10] sm:$0xff]  ;;  %v1799_v3 = vmov 0.0|0.0   ;;  %vm1800_vm0 = vmmov 0   ;;  %v1801_v6 = vmov 0.0  }
  0x10   :  { %1517 = vmatprep.subr.bf16.mxu0 %v1799_v3  ;;  %v1518_v4 = vpack.c.bf16 %v48_v1, %v47_v0  ;;  %v50_v5 = vld [vmem:[%s2197_s2 + $0x18] sm:$0xff]  ;;  %1181 = vmatprep.mubr.msk.f32.mxu0 %vm1800_vm0, %v1801_v6  ;;  %v198_v7 = vld [vmem:[%s2199_s4] sm:$0xff]  ;;  %v199_v8 = vld [vmem:[%s2199_s4 + $0x8] sm:$0xff]  ;;  %vm58_vm1 = vcmask 261120   ;;  %s187_s0 = sld [smem:[#allocation3]]  ;;  %vm196_vm2 = vcmask 1040384  }
  0x11   :  { %1523 = vmatprep.subr.bf16.mxu1 %v1799_v3  ;;  %1234 = vmatprep.mubr.msk.f32.mxu1 %vm1800_vm0, %v1801_v6  ;;  %v1521_v9 = vpack.c.bf16 %v50_v5, %v49_v2  ;;  %v1870_v10 = vpack.c.bf16 %v199_v8, %v198_v7  ;;  %v200_v11 = vld [vmem:[%s2199_s4 + $0x10] sm:$0xff]  ;;  %v201_v12 = vld [vmem:[%s2199_s4 + $0x18] sm:$0xff]  ;;  %v202_v14 = vld [vmem:[%s2199_s4 + $0x20] sm:$0xff]  ;;  %s995_s12 = sld [smem:[#allocation3 + $0x81]]  ;;  %s994_s13 = sld [smem:[#allocation3 + $0x80]] }
  0x12   :  { %1519 = vmatpush3.bf16.msra.mxu0 %v1518_v4  ;;  %v1880_v13 = vpack.c.bf16 %v201_v12, %v200_v11  ;;  %v203_v15 = vld [vmem:[%s2199_s4 + $0x28] sm:$0xff]  ;;  %v40_v16 = vld [vmem:[%s2196_s1] sm:$0xff]  ;;  %v204_v18 = vld [vmem:[%s2199_s4 + $0x30] sm:$0xff]  ;;  %s997_s16 = sld [smem:[#allocation3 + $0x101]]  ;;  %s996_s2 = sld [smem:[#allocation3 + $0x100]] }
  0x13   :  { %1520 = vmatprep.subr.bf16.mxu0 %v1799_v3  ;;  %1525 = vmatpush3.bf16.msra.mxu1 %v1870_v10  ;;  %v1894_v17 = vpack.c.bf16 %v203_v15, %v202_v14  ;;  %v205_v19 = vld [vmem:[%s2199_s4 + $0x38] sm:$0xff]  ;;  %v41_v20 = vld [vmem:[%s2196_s1 + $0x8] sm:$0xff]  ;;  %v206_v22 = vld [vmem:[%s2199_s4 + $0x40] sm:$0xff]  ;;  %s999_s19 = sld [smem:[#allocation3 + $0x181]]  ;;  %s998_s20 = sld [smem:[#allocation3 + $0x180]] }
  0x14   :  { %1526 = vmatprep.subr.bf16.mxu1 %v1799_v3  ;;  %v1912_v21 = vpack.c.bf16 %v205_v19, %v204_v18  ;;  %v207_v23 = vld [vmem:[%s2199_s4 + $0x48] sm:$0xff]  ;;  %v42_v24 = vld [vmem:[%s2196_s1 + $0x10] sm:$0xff]  ;;  %v209_v27 = vld [vmem:[%s2199_s4 + $0x58] sm:$0xff]  ;;  %s1001_s23 = sld [smem:[#allocation3 + $0x201]]  ;;  %s1000_s24 = sld [smem:[#allocation3 + $0x200]] }
  0x15   :  { %v1930_v25 = vpack.c.bf16 %v207_v23, %v206_v22  ;;  %v208_v26 = vld [vmem:[%s2199_s4 + $0x50] sm:$0xff]  ;;  %v43_v28 = vld [vmem:[%s2196_s1 + $0x18] sm:$0xff]  ;;  %v210_v30 = vld [vmem:[%s2199_s4 + $0x60] sm:$0xff]  ;;  %s1003_s27 = sld [smem:[#allocation3 + $0x281]]  ;;  %s1002_s28 = sld [smem:[#allocation3 + $0x280]] }
  0x16   :  { %1522 = vmatpush3.bf16.msra.mxu0 %v1521_v9  ;;  %v1948_v29 = vpack.c.bf16 %v209_v27, %v208_v26  ;;  %v211_v31 = vld [vmem:[%s2199_s4 + $0x68] sm:$0xff]  ;;  %v44_v32 = vld [vmem:[%s2196_s1 + $0x20] sm:$0xff]  ;;  %v212_v34 = vld [vmem:[%s2199_s4 + $0x70] sm:$0xff]  ;;  %s188_s11 = scalar_lea.vmem [#allocation2], %s187_s0 }
  0x17   :  { %1547 = vmatprep.subr.bf16.mxu0 %v1799_v3  ;;  %1528 = vmatpush3.bf16.msra.mxu1 %v1880_v13  ;;  %v1966_v33 = vpack.c.bf16 %v211_v31, %v210_v30  ;;  %v213_v35 = vld [vmem:[%s2199_s4 + $0x78] sm:$0xff]  ;;  %v45_v36 = vld [vmem:[%s2196_s1 + $0x28] sm:$0xff]  ;;  %v46_v38 = vld [vmem:[%s2196_s1 + $0x30] sm:$0x3]  ;;  %s290_s14 = scalar_lea.vmem [#allocation2], %s995_s12  ;;  %s287_s15 = scalar_lea.vmem [#allocation2], %s994_s13 }
  0x18   :  { %1529 = vmatprep.subr.bf16.mxu1 %v1799_v3  ;;  %v1984_v37 = vpack.c.bf16 %v213_v35, %v212_v34  ;;  %v985_v39 = vld [vmem:[%s2198_s3] ss:$0 sm:$0xff]  ;;  %s993_s3 = sld [smem:[#allocation3 + $0x1]]  ;;  %s372_s17 = scalar_lea.vmem [#allocation2], %s997_s16 }
  0x19   :  { %1182 = vmatmul.mubr.msk.f32.vlgmr.msra.gmra.mrb[0].mxu0 %vm58_vm1, %v40_v16  ;;  %s369_s18 = scalar_lea.vmem [#allocation2], %s996_s2  ;;  %s454_s21 = scalar_lea.vmem [#allocation2], %s999_s19 }
  0x1a   :  { %1184 = vmatprep.mubr.msk.f32.mxu0 %vm1800_vm0, %v1801_v6  ;;  %1549 = vmatpush3.bf16.msra.mxu0 %v1870_v10  ;;  %s451_s22 = scalar_lea.vmem [#allocation2], %s998_s20  ;;  %s536_s25 = scalar_lea.vmem [#allocation2], %s1001_s23 }
  0x1b   :  { %1550 = vmatprep.subr.bf16.mxu0 %v1799_v3  ;;  %1531 = vmatpush3.bf16.msra.mxu1 %v1894_v17  ;;  %s533_s26 = scalar_lea.vmem [#allocation2], %s1000_s24  ;;  %s618_s29 = scalar_lea.vmem [#allocation2], %s1003_s27 }
  0x1c   :  { %1532 = vmatprep.subr.bf16.mxu1 %v1799_v3  ;;  %s615_s30 = scalar_lea.vmem [#allocation2], %s1002_s28  ;;  %s1005_s23 = sld [smem:[#allocation3 + $0x301]] }
  0x1d   :  { %1185 = vmatmul.mubr.msk.f32.gmra.mrb[2].mxu0 %vm58_vm1, %v41_v20  ;;  %s1004_s24 = sld [smem:[#allocation3 + $0x300]]  ;;  %s1007_s12 = sld [smem:[#allocation3 + $0x381]] }
  0x1e   :  { %1187 = vmatprep.mubr.msk.f32.mxu0 %vm1800_vm0, %v1801_v6  ;;  %1552 = vmatpush3.bf16.msra.mxu0 %v1880_v13  ;;  %s191_s10 = scalar_lea.vmem [#allocation2], %s993_s3  ;;  %s1006_s13 = sld [smem:[#allocation3 + $0x380]] }
  0x1f   :  { %1553 = vmatprep.subr.bf16.mxu0 %v1799_v3  ;;  %1534 = vmatpush3.bf16.msra.mxu1 %v1912_v21  ;;  %s1802_s2 = smov [#allocation6]  }
  0x20   :  { %1535 = vmatprep.subr.bf16.mxu1 %v1799_v3 }
  0x21   :  { %1188 = vmatmul.mubr.msk.f32.gmra.mrb[4].mxu0 %vm58_vm1, %v42_v24 }
  0x22   :  { %1190 = vmatprep.mubr.msk.f32.mxu0 %vm1800_vm0, %v1801_v6  ;;  %1555 = vmatpush3.bf16.msra.mxu0 %v1894_v17 }
  0x23   :  { %1556 = vmatprep.subr.bf16.mxu0 %v1799_v3  ;;  %1537 = vmatpush3.bf16.msra.mxu1 %v1930_v25 }
  0x24   :  { %1538 = vmatprep.subr.bf16.mxu1 %v1799_v3 }
  0x25   :  { %1191 = vmatmul.mubr.msk.f32.gmra.mrb[6].mxu0 %vm58_vm1, %v43_v28 }
  0x26   :  { %1193 = vmatprep.mubr.msk.f32.mxu0 %vm1800_vm0, %v1801_v6  ;;  %1558 = vmatpush3.bf16.msra.mxu0 %v1912_v21 }
  0x27   :  { %1559 = vmatprep.subr.bf16.mxu0 %v1799_v3  ;;  %1540 = vmatpush3.bf16.msra.mxu1 %v1948_v29 }
  0x28   :  { %1541 = vmatprep.subr.bf16.mxu1 %v1799_v3 }
  0x29   :  { %1194 = vmatmul.mubr.msk.f32.gmra.mrb[8].mxu0 %vm58_vm1, %v44_v32 }
  0x2a   :  { %1196 = vmatprep.mubr.msk.f32.mxu0 %vm1800_vm0, %v1801_v6  ;;  %1561 = vmatpush3.bf16.msra.mxu0 %v1930_v25 }
  0x2b   :  { %1562 = vmatprep.subr.bf16.mxu0 %v1799_v3  ;;  %1543 = vmatpush3.bf16.msra.mxu1 %v1966_v33 }
  0x2c   :  { %1544 = vmatprep.subr.bf16.mxu1 %v1799_v3 }
  0x2d   :  { %1197 = vmatmul.mubr.msk.f32.gmra.mrb[10].mxu0 %vm58_vm1, %v45_v36 }
  0x2e   :  { %1199 = vmatprep.mubr.msk.f32.mxu0 %vm1800_vm0, %v1801_v6  ;;  %1564 = vmatpush3.bf16.msra.mxu0 %v1948_v29 }
  0x2f   :  { %1565 = vmatprep.subr.bf16.mxu0 %v1799_v3  ;;  %1546 = vmatpush3.bf16.msra.mxu1 %v1984_v37 }
  0x30   :  { %1571 = vmatprep.subr.bf16.mxu1 %v1799_v3 }
  0x31   :  { %1200 = vmatmul.mubr.msk.f32.gmra.mrb[12].mxu0 %vm58_vm1, %v46_v38 }
  0x32   :  { %1567 = vmatpush3.bf16.msra.mxu0 %v1966_v33  ;;  %1269 = vmatprep.mubr.msk.f32.mxu0 %vm1800_vm0, %v1801_v6 }
  0x33   :  { %1235 = vmatmul.mubr.f32.vlgmr.msra.gmra.mrb[0].mxu1 %v1801_v6  ;;  %1568 = vmatprep.subr.bf16.mxu0 %v1799_v3 }
  0x34   :  { %1573 = vmatpush3.bf16.msra.mxu1 %v1870_v10  ;;  %1304 = vmatprep.mubr.msk.f32.mxu1 %vm1800_vm0, %v1801_v6 }
  0x35   :  { %1574 = vmatprep.subr.bf16.mxu1 %v1799_v3 }
  0x36   :  { %1570 = vmatpush3.bf16.msra.mxu0 %v1984_v37 }
  0x37   :  { %1595 = vmatprep.subr.bf16.mxu0 %v1799_v3 }
  0x38   :  { %1576 = vmatpush3.bf16.msra.mxu1 %v1880_v13 }
  0x39   :  { %1577 = vmatprep.subr.bf16.mxu1 %v1799_v3 }
  0x3c   :  { %1579 = vmatpush3.bf16.msra.mxu1 %v1894_v17 }
  0x3d   :  { %1580 = vmatprep.subr.bf16.mxu1 %v1799_v3 }
  0x40   :  { %1582 = vmatpush3.bf16.msra.mxu1 %v1912_v21 }
  0x41   :  { %1583 = vmatprep.subr.bf16.mxu1 %v1799_v3 }
  0x44   :  { %1585 = vmatpush3.bf16.msra.mxu1 %v1930_v25 }
  0x45   :  { %1586 = vmatprep.subr.bf16.mxu1 %v1799_v3 }
  0x48   :  { %1588 = vmatpush3.bf16.msra.mxu1 %v1948_v29 }
  0x49   :  { %1589 = vmatprep.subr.bf16.mxu1 %v1799_v3 }
  0x4c   :  { %1591 = vmatpush3.bf16.msra.mxu1 %v1966_v33 }
  0x4d   :  { %1592 = vmatprep.subr.bf16.mxu1 %v1799_v3 }
  0x50   :  { %1594 = vmatpush3.bf16.msra.mxu1 %v1984_v37 }
  0x51   :  { %1619 = vmatprep.subr.bf16.mxu1 %v1799_v3 }
  0xec   :  { %v146_v40 = vpop.f32.mrb[0].mxu0 }
  0xed   :  { %v147_v41 = vadd.f32 %v985_v39, %v146_v40  ;;  %v1183_v42 = vpop.f32.mrb[1].mxu0 }
  0xef   :  { %180 = vst [vmem:[#allocation2] sm:$0xff] %v147_v41 }
  0xf0   :  { %v151_v43 = vpop.f32.mrb[2].mxu0 }
  0xf1   :  { %v152_v44 = vadd.f32 %v985_v39, %v151_v43  ;;  %v1186_v45 = vpop.f32.mrb[3].mxu0 }
  0xf3   :  { %181 = vst [vmem:[#allocation2 + $0x8] sm:$0xff] %v152_v44 }
  0xf4   :  { %v156_v46 = vpop.f32.mrb[4].mxu0 }
  0xf5   :  { %v157_v47 = vadd.f32 %v985_v39, %v156_v46  ;;  %v1189_v48 = vpop.f32.mrb[5].mxu0 }
  0xf7   :  { %182 = vst [vmem:[#allocation2 + $0x10] sm:$0xff] %v157_v47 }
  0xf8   :  { %v161_v49 = vpop.f32.mrb[6].mxu0 }
  0xf9   :  { %v162_v50 = vadd.f32 %v985_v39, %v161_v49  ;;  %v1192_v51 = vpop.f32.mrb[7].mxu0  ;;  %v862_v49 = vld [vmem:[%s2200_s5 + $0x10] sm:$0xff] }
  0xfa   :  { %v863_v51 = vld [vmem:[%s2200_s5 + $0x18] sm:$0xff] }
  0xfb   :  { %183 = vst [vmem:[#allocation2 + $0x18] sm:$0xff] %v162_v50 }
  0xfc   :  { %v166_v52 = vpop.f32.mrb[8].mxu0 }
  0xfd   :  { %v167_v53 = vadd.f32 %v985_v39, %v166_v52  ;;  %v1195_v54 = vpop.f32.mrb[9].mxu0  ;;  %v1719_v52 = vpack.c.bf16 %v863_v51, %v862_v49 }
  0xff   :  { %184 = vst [vmem:[#allocation2 + $0x20] sm:$0xff] %v167_v53  ;;  %v865_v53 = vld [vmem:[%s2200_s5 + $0x28] sm:$0xff] }
 0x100   :  { %v171_v55 = vpop.f32.mrb[10].mxu0 }
 0x101   :  { %v172_v56 = vadd.f32 %v985_v39, %v171_v55  ;;  %v1198_v57 = vpop.f32.mrb[11].mxu0  ;;  %v866_v55 = vld [vmem:[%s2200_s5 + $0x30] sm:$0xff] }
 0x103   :  { %185 = vst [vmem:[#allocation2 + $0x28] sm:$0xff] %v172_v56  ;;  %v867_v56 = vld [vmem:[%s2200_s5 + $0x38] sm:$0xff] }
 0x104   :  { %v176_v58 = vpop.f32.mrb[12].mxu0  ;;  %v1725_v57 = vpack.c.bf16 %v867_v56, %v866_v55 }
 0x105   :  { %v177_v59 = vadd.f32 %v985_v39, %v176_v58  ;;  %v1201_v60 = vpop.f32.mrb[13].mxu0  ;;  %v868_v58 = vld [vmem:[%s2200_s5 + $0x40] sm:$0xff] }
 0x106   :  { %v280_v61 = vpop.f32.mrb[0].mxu1 }
 0x107   :  { %186 = vst [vmem:[#allocation2 + $0x30] sm:$0x3] %v177_v59  ;;  %v1236_v62 = vpop.f32.mrb[1].mxu1  ;;  %v869_v59 = vld [vmem:[%s2200_s5 + $0x48] sm:$0xff] }
 0x108   :  { %v1728_v60 = vpack.c.bf16 %v869_v59, %v868_v58 }
 0x10e   :  { %v192_v63 = vld [vmem:[%s191_s10] sm:$0x1] }
 0x10f   :  { %v194_v0 = vrot.slane %v192_v63, 7  ;;  %v189_v1 = vld [vmem:[%s188_s11] sm:$0x1] }
 0x110   :  { %v291_v7 = vld [vmem:[%s290_s14] sm:$0x1]  ;;  %s782_s14 = scalar_lea.vmem [#allocation2], %s1007_s12 }
 0x111   :  { %v197_v2 = vsel %vm196_vm2, %v189_v1, %v194_v0  ;;  %v293_v8 = vrot.slane %v291_v7, 7  ;;  %v288_v9 = vld [vmem:[%s287_s15] sm:$0x1]  ;;  %v870_v7 = vld [vmem:[%s2200_s5 + $0x50] sm:$0xff]  ;;  %s779_s15 = scalar_lea.vmem [#allocation2], %s1006_s13 }
 0x112   :  { %v284_v4 = vadd.f32 %v280_v61, %v197_v2  ;;  %v373_v18 = vld [vmem:[%s372_s17] sm:$0x1]  ;;  %s960_s17 = sshll.u32 %s1802_s2, 4  ;;  %s961_s17 = int_to_ptr.vmem [resolvable:$true] %s960_s17 }
 0x113   :  { %v295_v11 = vsel %vm196_vm2, %v288_v9, %v293_v8  ;;  %v375_v19 = vrot.slane %v373_v18, 7  ;;  %v370_v20 = vld [vmem:[%s369_s18] sm:$0x1]  ;;  %v871_v8 = vld [vmem:[%s2200_s5 + $0x58] sm:$0xff]  ;;  %s1772_s18 = scalar_lea.vmem %s961_s17, 32  ;;  %p1777_p6 = scmp.lt.s32.totalorder %s961_s17, %s961_s17 }
 0x114   :  { %1744 = vtanh.f32 %v284_v4  ;;  %v455_v28 = vld [vmem:[%s454_s21] sm:$0x1]  ;;  %p1773_p5 = scmp.ne.s32.totalorder %s961_s17, %s1772_s18  ;;  %p1778_p7 = scmp.lt.s32.totalorder %s1772_s18, %s1772_s18 }
 0x115   :  { %v377_v22 = vsel %vm196_vm2, %v370_v20, %v375_v19  ;;  %v457_v30 = vrot.slane %v455_v28, 7  ;;  %v452_v31 = vld [vmem:[%s451_s22] sm:$0x1] }
 0x116   :  { %v537_v39 = vld [vmem:[%s536_s25] sm:$0x1]  ;;  %s700_s25 = scalar_lea.vmem [#allocation2], %s1005_s23  ;;  %p1779_p8 = por %p1778_p7, %p1777_p6 }
 0x117   :  { %v459_v32 = vsel %vm196_vm2, %v452_v31, %v457_v30  ;;  %v539_v40 = vrot.slane %v537_v39, 7  ;;  %v534_v41 = vld [vmem:[%s533_s26] sm:$0x1]  ;;  %s697_s26 = scalar_lea.vmem [#allocation2], %s1004_s24 }
 0x118   :  { %v701_v61 = vld [vmem:[%s700_s25] sm:$0x1]  ;;  %p1780_p9 = pnand %p1779_p8, %p1773_p5 }
 0x119   :  { %v541_v42 = vsel %vm196_vm2, %v534_v41, %v539_v40  ;;  %v703_v62 = vrot.slane %v701_v61, 7  ;;  %v698_v63 = vld [vmem:[%s697_s26] sm:$0x1] }
 0x11a   :  { %v872_v9 = vld [vmem:[%s2200_s5 + $0x60] sm:$0xff] }
 0x11b   :  { %v705_v0 = vsel %vm196_vm2, %v698_v63, %v703_v62  ;;  %v783_v19 = vld [vmem:[%s782_s14] sm:$0x1] }
 0x11c   :  { %v785_v20 = vrot.slane %v783_v19, 7 }
 0x11e   :  { %v1745_v5 = vpop.eup %1744 }
 0x11f   :  { %1270 = vmatmul.mubr.f32.vlgmr.msra.gmra.mrb[14].mxu0 %v1745_v5 }
 0x120   :  { %1597 = vmatpush3.bf16.msra.mxu0 %v1870_v10  ;;  %1339 = vmatprep.mubr.msk.f32.mxu0 %vm1800_vm0, %v1801_v6 }
 0x121   :  { %1598 = vmatprep.subr.bf16.mxu0 %v1799_v3 }
 0x124   :  { %1600 = vmatpush3.bf16.msra.mxu0 %v1880_v13 }
 0x125   :  { %1601 = vmatprep.subr.bf16.mxu0 %v1799_v3 }
 0x128   :  { %1603 = vmatpush3.bf16.msra.mxu0 %v1894_v17 }
 0x129   :  { %1604 = vmatprep.subr.bf16.mxu0 %v1799_v3 }
 0x12c   :  { %1606 = vmatpush3.bf16.msra.mxu0 %v1912_v21 }
 0x12d   :  { %1607 = vmatprep.subr.bf16.mxu0 %v1799_v3 }
 0x130   :  { %1609 = vmatpush3.bf16.msra.mxu0 %v1930_v25 }
 0x131   :  { %1610 = vmatprep.subr.bf16.mxu0 %v1799_v3 }
 0x134   :  { %1612 = vmatpush3.bf16.msra.mxu0 %v1948_v29 }
 0x135   :  { %1613 = vmatprep.subr.bf16.mxu0 %v1799_v3 }
 0x138   :  { %1615 = vmatpush3.bf16.msra.mxu0 %v1966_v33 }
 0x139   :  { %1616 = vmatprep.subr.bf16.mxu0 %v1799_v3 }
 0x13c   :  { %1618 = vmatpush3.bf16.msra.mxu0 %v1984_v37 }
 0x13d   :  { %1643 = vmatprep.subr.bf16.mxu0 %v1799_v3 }
 0x1f2   :  { %v362_v12 = vpop.f32.mrb[14].mxu0 }
 0x1f3   :  { %v366_v14 = vadd.f32 %v362_v12, %v295_v11  ;;  %v1271_v15 = vpop.f32.mrb[15].mxu0  ;;  %v1731_v11 = vpack.c.bf16 %v871_v8, %v870_v7  ;;  %v873_v12 = vld [vmem:[%s2200_s5 + $0x68] sm:$0xff] }
 0x1f4   :  { %v874_v15 = vld [vmem:[%s2200_s5 + $0x70] sm:$0xff] }
 0x1f5   :  { %1746 = vtanh.f32 %v366_v14  ;;  %v1734_v14 = vpack.c.bf16 %v873_v12, %v872_v9 }
 0x1ff   :  { %v1747_v16 = vpop.eup %1746 }
 0x200   :  { %1305 = vmatmul.mubr.f32.vlgmr.msra.gmra.mrb[2].mxu1 %v1747_v16  ;;  %v875_v16 = vld [vmem:[%s2200_s5 + $0x78] sm:$0xff] }
 0x201   :  { %1621 = vmatpush3.bf16.msra.mxu1 %v1870_v10  ;;  %1374 = vmatprep.mubr.msk.f32.mxu1 %vm1800_vm0, %v1801_v6  ;;  %v1737_v18 = vpack.c.bf16 %v875_v16, %v874_v15 }
 0x202   :  { %1622 = vmatprep.subr.bf16.mxu1 %v1799_v3 }
 0x205   :  { %1624 = vmatpush3.bf16.msra.mxu1 %v1880_v13 }
 0x206   :  { %1625 = vmatprep.subr.bf16.mxu1 %v1799_v3 }
 0x209   :  { %1627 = vmatpush3.bf16.msra.mxu1 %v1894_v17 }
 0x20a   :  { %1628 = vmatprep.subr.bf16.mxu1 %v1799_v3 }
 0x20d   :  { %1630 = vmatpush3.bf16.msra.mxu1 %v1912_v21 }
 0x20e   :  { %1631 = vmatprep.subr.bf16.mxu1 %v1799_v3 }
 0x211   :  { %1633 = vmatpush3.bf16.msra.mxu1 %v1930_v25 }
 0x212   :  { %1634 = vmatprep.subr.bf16.mxu1 %v1799_v3 }
 0x215   :  { %1636 = vmatpush3.bf16.msra.mxu1 %v1948_v29 }
 0x216   :  { %1637 = vmatprep.subr.bf16.mxu1 %v1799_v3 }
 0x219   :  { %1639 = vmatpush3.bf16.msra.mxu1 %v1966_v33 }
 0x21a   :  { %1640 = vmatprep.subr.bf16.mxu1 %v1799_v3 }
 0x21d   :  { %1642 = vmatpush3.bf16.msra.mxu1 %v1984_v37 }
 0x21e   :  { %1667 = vmatprep.subr.bf16.mxu1 %v1799_v3 }
 0x2d3   :  { %v444_v23 = vpop.f32.mrb[2].mxu1 }
 0x2d4   :  { %v448_v24 = vadd.f32 %v444_v23, %v377_v22  ;;  %v1306_v26 = vpop.f32.mrb[3].mxu1  ;;  %v780_v22 = vld [vmem:[%s779_s15] sm:$0x1] }
 0x2d5   :  { %v787_v23 = vsel %vm196_vm2, %v780_v22, %v785_v20 }
 0x2d6   :  { %1748 = vtanh.f32 %v448_v24 }
 0x2e0   :  { %v1749_v27 = vpop.eup %1748 }
 0x2e1   :  { %1340 = vmatmul.mubr.f32.vlgmr.msra.gmra.mrb[16].mxu0 %v1749_v27 }
 0x2e2   :  { %1645 = vmatpush3.bf16.msra.mxu0 %v1870_v10  ;;  %1409 = vmatprep.mubr.msk.f32.mxu0 %vm1800_vm0, %v1801_v6 }
 0x2e3   :  { %1646 = vmatprep.subr.bf16.mxu0 %v1799_v3 }
 0x2e6   :  { %1648 = vmatpush3.bf16.msra.mxu0 %v1880_v13 }
 0x2e7   :  { %1649 = vmatprep.subr.bf16.mxu0 %v1799_v3 }
 0x2ea   :  { %1651 = vmatpush3.bf16.msra.mxu0 %v1894_v17 }
 0x2eb   :  { %1652 = vmatprep.subr.bf16.mxu0 %v1799_v3 }
 0x2ee   :  { %1654 = vmatpush3.bf16.msra.mxu0 %v1912_v21 }
 0x2ef   :  { %1655 = vmatprep.subr.bf16.mxu0 %v1799_v3 }
 0x2f2   :  { %1657 = vmatpush3.bf16.msra.mxu0 %v1930_v25 }
 0x2f3   :  { %1658 = vmatprep.subr.bf16.mxu0 %v1799_v3 }
 0x2f6   :  { %1660 = vmatpush3.bf16.msra.mxu0 %v1948_v29 }
 0x2f7   :  { %1661 = vmatprep.subr.bf16.mxu0 %v1799_v3 }
 0x2fa   :  { %1663 = vmatpush3.bf16.msra.mxu0 %v1966_v33 }
 0x2fb   :  { %1664 = vmatprep.subr.bf16.mxu0 %v1799_v3 }
 0x2fe   :  { %1666 = vmatpush3.bf16.msra.mxu0 %v1984_v37 }
 0x2ff   :  { %1691 = vmatprep.subr.bf16.mxu0 %v1799_v3 }
 0x3b4   :  { %v526_v34 = vpop.f32.mrb[16].mxu0 }
 0x3b5   :  { %v530_v35 = vadd.f32 %v526_v34, %v459_v32  ;;  %v1341_v36 = vpop.f32.mrb[17].mxu0 }
 0x3b7   :  { %1750 = vtanh.f32 %v530_v35 }
 0x3c1   :  { %v1751_v38 = vpop.eup %1750 }
 0x3c2   :  { %1375 = vmatmul.mubr.f32.vlgmr.msra.gmra.mrb[4].mxu1 %v1751_v38 }
 0x3c3   :  { %1669 = vmatpush3.bf16.msra.mxu1 %v1870_v10  ;;  %1444 = vmatprep.mubr.msk.f32.mxu1 %vm1800_vm0, %v1801_v6 }
 0x3c4   :  { %1670 = vmatprep.subr.bf16.mxu1 %v1799_v3 }
 0x3c7   :  { %1672 = vmatpush3.bf16.msra.mxu1 %v1880_v13 }
 0x3c8   :  { %1673 = vmatprep.subr.bf16.mxu1 %v1799_v3 }
 0x3cb   :  { %1675 = vmatpush3.bf16.msra.mxu1 %v1894_v17 }
 0x3cc   :  { %1676 = vmatprep.subr.bf16.mxu1 %v1799_v3 }
 0x3cf   :  { %1678 = vmatpush3.bf16.msra.mxu1 %v1912_v21 }
 0x3d0   :  { %1679 = vmatprep.subr.bf16.mxu1 %v1799_v3 }
 0x3d3   :  { %1681 = vmatpush3.bf16.msra.mxu1 %v1930_v25 }
 0x3d4   :  { %1682 = vmatprep.subr.bf16.mxu1 %v1799_v3 }
 0x3d7   :  { %1684 = vmatpush3.bf16.msra.mxu1 %v1948_v29 }
 0x3d8   :  { %1685 = vmatprep.subr.bf16.mxu1 %v1799_v3 }
 0x3db   :  { %1687 = vmatpush3.bf16.msra.mxu1 %v1966_v33 }
 0x3dc   :  { %1688 = vmatprep.subr.bf16.mxu1 %v1799_v3 }
 0x3df   :  { %1690 = vmatpush3.bf16.msra.mxu1 %v1984_v37 }
 0x3e0   :  { %1715 = vmatprep.subr.bf16.mxu1 %v1799_v3 }
 0x495   :  { %v608_v43 = vpop.f32.mrb[4].mxu1 }
 0x496   :  { %v612_v44 = vadd.f32 %v608_v43, %v541_v42  ;;  %v1376_v45 = vpop.f32.mrb[5].mxu1 }
 0x498   :  { %1752 = vtanh.f32 %v612_v44 }
 0x4a2   :  { %v1753_v46 = vpop.eup %1752 }
 0x4a3   :  { %1410 = vmatmul.mubr.f32.vlgmr.msra.gmra.mrb[18].mxu0 %v1753_v46 }
 0x4a4   :  { %1693 = vmatpush3.bf16.msra.mxu0 %v1870_v10  ;;  %1479 = vmatprep.mubr.msk.f32.mxu0 %vm1800_vm0, %v1801_v6  ;;  %v619_v10 = vld [vmem:[%s618_s29] sm:$0x1] }
 0x4a5   :  { %1694 = vmatprep.subr.bf16.mxu0 %v1799_v3 }
 0x4a8   :  { %1696 = vmatpush3.bf16.msra.mxu0 %v1880_v13  ;;  %v621_v13 = vrot.slane %v619_v10, 7 }
 0x4a9   :  { %1697 = vmatprep.subr.bf16.mxu0 %v1799_v3 }
 0x4ac   :  { %1699 = vmatpush3.bf16.msra.mxu0 %v1894_v17  ;;  %v616_v17 = vld [vmem:[%s615_s30] sm:$0x1] }
 0x4ad   :  { %1700 = vmatprep.subr.bf16.mxu0 %v1799_v3 }
 0x4b0   :  { %1702 = vmatpush3.bf16.msra.mxu0 %v1912_v21  ;;  %v623_v21 = vsel %vm196_vm2, %v616_v17, %v621_v13 }
 0x4b1   :  { %1703 = vmatprep.subr.bf16.mxu0 %v1799_v3 }
 0x4b4   :  { %1705 = vmatpush3.bf16.msra.mxu0 %v1930_v25 }
 0x4b5   :  { %1706 = vmatprep.subr.bf16.mxu0 %v1799_v3 }
 0x4b8   :  { %1708 = vmatpush3.bf16.msra.mxu0 %v1948_v29 }
 0x4b9   :  { %1709 = vmatprep.subr.bf16.mxu0 %v1799_v3 }
 0x4bc   :  { %1711 = vmatpush3.bf16.msra.mxu0 %v1966_v33  ;;  %v860_v33 = vld [vmem:[%s2200_s5] sm:$0xff] }
 0x4bd   :  { %1712 = vmatprep.subr.bf16.mxu0 %v1799_v3 }
 0x4c0   :  { %1714 = vmatpush3.bf16.msra.mxu0 %v1984_v37  ;;  %v861_v37 = vld [vmem:[%s2200_s5 + $0x8] sm:$0xff] }
 0x4c1   :  { %v1716_v50 = vpack.c.bf16 %v861_v37, %v860_v33 }
 0x576   :  { %v690_v25 = vpop.f32.mrb[18].mxu0 }
 0x577   :  { %v694_v47 = vadd.f32 %v690_v25, %v623_v21  ;;  %v1411_v29 = vpop.f32.mrb[19].mxu0 }
 0x579   :  { %1754 = vtanh.f32 %v694_v47 }
 0x583   :  { %v1755_v48 = vpop.eup %1754 }
 0x584   :  { %1445 = vmatmul.mubr.f32.vlgmr.msra.gmra.mrb[6].mxu1 %v1755_v48 }
 0x585   :  { %1514 = vmatprep.mubr.msk.f32.mxu1 %vm1800_vm0, %v1801_v6  ;;  %1717 = vmatpush3.bf16.msra.mxu1 %v1716_v50  ;;  %v864_v6 = vld [vmem:[%s2200_s5 + $0x20] sm:$0xff] }
 0x586   :  { %1718 = vmatprep.subr.bf16.mxu1 %v1799_v3  ;;  %v1722_v54 = vpack.c.bf16 %v865_v53, %v864_v6 }
 0x589   :  { %1720 = vmatpush3.bf16.msra.mxu1 %v1719_v52 }
 0x58a   :  { %1721 = vmatprep.subr.bf16.mxu1 %v1799_v3 }
 0x58d   :  { %1723 = vmatpush3.bf16.msra.mxu1 %v1722_v54 }
 0x58e   :  { %1724 = vmatprep.subr.bf16.mxu1 %v1799_v3 }
 0x591   :  { %1726 = vmatpush3.bf16.msra.mxu1 %v1725_v57 }
 0x592   :  { %1727 = vmatprep.subr.bf16.mxu1 %v1799_v3 }
 0x595   :  { %1729 = vmatpush3.bf16.msra.mxu1 %v1728_v60 }
 0x596   :  { %1730 = vmatprep.subr.bf16.mxu1 %v1799_v3 }
 0x599   :  { %1732 = vmatpush3.bf16.msra.mxu1 %v1731_v11 }
 0x59a   :  { %1733 = vmatprep.subr.bf16.mxu1 %v1799_v3 }
 0x59d   :  { %1735 = vmatpush3.bf16.msra.mxu1 %v1734_v14 }
 0x59e   :  { %1736 = vmatprep.subr.bf16.mxu1 %v1799_v3  ;;  %v1008_v3 = vld [vmem:[%s2201_s6] ss:$0 sm:$0xff] }
 0x5a1   :  { %1738 = vmatpush3.bf16.msra.mxu1 %v1737_v18 }
 0x657   :  { %v772_v1 = vpop.f32.mrb[6].mxu1 }
 0x658   :  { %v776_v2 = vadd.f32 %v772_v1, %v705_v0  ;;  %v1446_v4 = vpop.f32.mrb[7].mxu1 }
 0x65a   :  { %1756 = vtanh.f32 %v776_v2 }
 0x664   :  { %v1757_v5 = vpop.eup %1756 }
 0x665   :  { %1480 = vmatmul.mubr.f32.vlgmr.msra.gmra.mrb[20].mxu0 %v1757_v5 }
 0x738   :  { %v854_v24 = vpop.f32.mrb[20].mxu0 }
 0x739   :  { %v858_v26 = vadd.f32 %v854_v24, %v787_v23  ;;  %v1481_v27 = vpop.f32.mrb[21].mxu0 }
 0x73b   :  { %1758 = vtanh.f32 %v858_v26 }
 0x745   :  { %v1759_v28 = vpop.eup %1758 }
 0x746   :  { %1515 = vmatmul.mubr.f32.vlgmr.msra.gmra.mrb[8].mxu1 %v1759_v28 }
 0x819   :  { %v949_v30 = vpop.f32.mrb[8].mxu1 }
 0x81a   :  { %v950_v31 = vadd.f32 %v1008_v3, %v949_v30  ;;  %v1516_v32 = vpop.f32.mrb[9].mxu1 }
 0x81c   :  { %953 = vst [vmem:[#allocation6] sm:$0x3] %v950_v31 }
 0x81d   :  { %1783 = shalt.err (!%p1780_p9)
}
 0x81e   :  { %s1784_s21 = scalar_lea.hbm %s2202_s7, 32 }
 0x81f   :  { %p1785_p10 = scmp.ne.s32.totalorder %s2202_s7, %s1784_s21  ;;  %p1788_p11 = scmp.lt.u32.totalorder %s1784_s21, %s2202_s7 }
 0x821   :  { %p1790_p12 = pnand %p1788_p11, %p1785_p10 }
 0x823   :  { %1793 = shalt.err (!%p1790_p12)
}
 0x824   :  { %963 = dma.vmem_to_hbm [thread:$0]  %s961_s17, 32, %s2202_s7, [#allocation4]  }
 0x825   :  { %1796 = dma.done.wait [#allocation4], 32  }
 0x826   :  { %1797 = vsyncadd [#allocation4], 4294967264 }
 0x827   :  { %967 = vsyncpa [#allocation4], 1 }
 0x828   :  { %968 = vsyncpa [#allocation5], 1 }

</bundles_post_ra>
